<compile_context>
chip_gen: v7x
topology: tpu7x:2x2x1
jax: 0.10.0
libtpu: 0.0.40
codegen_flags: <defaults>
</compile_context>

<pallas_src>
import functools
import math

import jax
import jax.numpy as jnp
from jax.experimental import pallas as pl
from jax.experimental.pallas import tpu as pltpu


def _softmax_kernel(x_ref, o_ref, *, n_seg, seg_len, compute_dtype):
    """Numerically-stable softmax over `n_seg` independent width-`seg_len`
    segments of the lane axis. n_seg == 1 is the plain last-dim softmax;
    n_seg > 1 is the lane-dense small-D path (128//D rows folded per stored
    row)."""
    for f in range(n_seg):                      # static unroll (n_seg <= 16)
        lo = f * seg_len
        xs = x_ref[:, lo:lo + seg_len].astype(compute_dtype)
        m = jnp.max(xs, axis=-1, keepdims=True)
        e = jnp.exp(xs - m)
        # Denominator always accumulated in f32.
        s = jnp.sum(e, axis=-1, keepdims=True, dtype=jnp.float32)
        inv = pl.reciprocal(s, approx=True)     # EUP vrcp (otherwise-idle slot)
        inv = inv * (2.0 - s * inv)             # one Newton step -> ~f32-exact
        o_ref[:, lo:lo + seg_len] = (e * inv.astype(compute_dtype)).astype(o_ref.dtype)


def _sublane_multiple(dtype):
    itemsize = jnp.dtype(dtype).itemsize
    if itemsize >= 4:
        return 8
    if itemsize == 2:
        return 16
    return 32


def _round_up(x, m):
    return ((x + m - 1) // m) * m


def _vmem_limits():
    """Generation-aware (scoped VMEM limit, tile budget) in bytes."""
    try:
        cap = pltpu.get_tpu_info().vmem_capacity_bytes
    except Exception:
        cap = 64 * 1024 * 1024                  # conservative (v7x per-TC size)
    limit = min(64 * 1024 * 1024, (cap * 3) // 4)   # 64 MiB v5e/v6e, 48 MiB v7x
    budget = (limit * 3) // 4                        # headroom for compiler scratch
    return limit, budget


def softmax_lastdim(x, *, max_row_tile=1024, donate_input=False):
    """F.softmax(x, dim=-1) for any rank >= 1 input."""
    orig_shape = x.shape
    d = orig_shape[-1]
    rows = math.prod(orig_shape[:-1])

    # ---- lane-dense repack for small last dims -----------------------------
    # D < 128 would make every store a masked vst.msk and waste 128/D of each
    # vreg / VMEM tile / DMA. Fold 128//D logical rows into one stored row.
    n_seg = 1
    if 8 <= d < 128 and 128 % d == 0 and rows % (128 // d) == 0:
        n_seg = 128 // d
    rows_eff = max(rows // max(n_seg, 1), 1)
    d_eff = d * n_seg
    x2 = x.reshape(rows_eff, d_eff)             # contiguous -> free reshape

    # bf16 inputs keep bf16 intermediates (halves the exp slab); else f32.
    compute_dtype = jnp.bfloat16 if x2.dtype == jnp.bfloat16 else jnp.float32

    itemsize = jnp.dtype(x.dtype).itemsize
    cbytes = jnp.dtype(compute_dtype).itemsize
    sub = _sublane_multiple(x.dtype)
    vmem_limit, vmem_budget = _vmem_limits()

    # Per-row VMEM: 2x double-buffered input + 2x output pipeline buffers,
    # plus in-kernel working slabs (upcast x, exp result) and result staging.
    bytes_per_row = d_eff * (4 * itemsize + 2 * cbytes + 2 * itemsize)
    rt = vmem_budget // max(bytes_per_row, 1)
    rt = (rt // sub) * sub
    rt = min(rt, max_row_tile)
    if rt < sub:
        # TODO(synk): add a second "arbitrary" grid axis over D with an online
        # max/sum accumulator (flash-softmax) for rows too wide for one tile.
        raise NotImplementedError(
            f"last dim {d} too large for a single VMEM row slab "
            f"(budget {vmem_budget} bytes)")

    # Prefer >=2 grid steps only when each half-tile is still >= 512 rows
    # (keeps v7x megacore sharding without shrinking tiles on 1-TC chips).
    half = _round_up((rows_eff + 1) // 2, sub)
    if half >= 512:
        rt = min(rt, half)
    rt = min(rt, _round_up(rows_eff, sub))
    rt = max(rt, sub)

    grid = pl.cdiv(rows_eff, rt)

    nbytes = rows * d * itemsize
    cost = pl.CostEstimate(
        flops=7 * rows * d,
        transcendentals=rows * d,
        bytes_accessed=2 * nbytes,
    )

    kernel = functools.partial(
        _softmax_kernel, n_seg=n_seg, seg_len=d, compute_dtype=compute_dtype)

    out = pl.pallas_call(
        kernel,
        out_shape=jax.ShapeDtypeStruct((rows_eff, d_eff), x.dtype),
        grid_spec=pltpu.PrefetchScalarGridSpec(
            num_scalar_prefetch=0,
            grid=(grid,),
            in_specs=[pl.BlockSpec((rt, d_eff), lambda i: (i, 0))],
            out_specs=pl.BlockSpec((rt, d_eff), lambda i: (i, 0)),
        ),
        compiler_params=pltpu.CompilerParams(
            dimension_semantics=("parallel",),
            vmem_limit_bytes=vmem_limit,
        ),
        cost_estimate=cost,
        input_output_aliases=({0: 0} if donate_input else {}),
    )(x2)

    return out.reshape(orig_shape)


if __name__ == "__main__":
    key = jax.random.PRNGKey(0)
    k1, k2 = jax.random.split(key)

    # Shape consistent with the module: batch=2, channels=4, seq=8, hidden=32.
    # D=32 exercises the lane-dense folded path (4 rows per stored lane row).
    x = jax.random.normal(k1, (2, 4, 8, 32), dtype=jnp.float32)
    y = jax.block_until_ready(softmax_lastdim(x))
    ref = jax.nn.softmax(x, axis=-1)
    assert y.shape == x.shape and y.dtype == x.dtype
    assert jnp.allclose(y, ref, atol=1e-5, rtol=1e-5), "f32 mismatch vs reference"
    assert jnp.allclose(jnp.sum(y, axis=-1), 1.0, atol=1e-5), "rows not normalized"

    # bf16 input exercising the plain (D >= 128) path with bf16 intermediates.
    xb = jax.random.normal(k2, (2, 4, 8, 256), dtype=jnp.bfloat16)
    yb = jax.block_until_ready(softmax_lastdim(xb))
    refb = jax.nn.softmax(xb.astype(jnp.float32), axis=-1)
    assert yb.shape == xb.shape and yb.dtype == xb.dtype
    assert jnp.allclose(yb.astype(jnp.float32), refb, atol=2e-2), "bf16 mismatch"

    print("KERNEL_OK")
</pallas_src>

<mosaic_0001>
module attributes {stable_mosaic.version = 11 : i64} {
  func.func @_softmax_kernel(%arg0: i32, %arg1: memref<16x128xf32, #tpu.memory_space<vmem>>, %arg2: memref<16x128xf32, #tpu.memory_space<vmem>>) attributes {dimension_semantics = [#tpu.dimension_semantics<parallel>], iteration_bounds = array<i64: 1>, scalar_prefetch = 0 : i64, scratch_operands = 0 : i64, tpu.core_type = #tpu.core_type<tc>, window_params = [{transform_indices = @transform_0, window_bounds = array<i64: 16, 128>}, {transform_indices = @transform_1, window_bounds = array<i64: 16, 128>}]} {
    %c0 = arith.constant 0 : index
    %c0_0 = arith.constant 0 : index
    %0 = vector.load %arg1[%c0, %c0_0] : memref<16x128xf32, #tpu.memory_space<vmem>>, vector<16x32xf32>
    %cst = arith.constant dense<0xFF800000> : vector<16xf32>
    %1 = vector.multi_reduction <maximumf>, %0, %cst [1] : vector<16x32xf32> to vector<16xf32>
    %2 = vector.shape_cast %1 : vector<16xf32> to vector<16x1xf32>
    %3 = vector.broadcast %2 : vector<16x1xf32> to vector<16x32xf32>
    %4 = arith.subf %0, %3 : vector<16x32xf32>
    %5 = math.exp %4 : vector<16x32xf32>
    %cst_1 = arith.constant dense<0.000000e+00> : vector<16xf32>
    %6 = vector.multi_reduction <add>, %5, %cst_1 [1] : vector<16x32xf32> to vector<16xf32>
    %7 = vector.shape_cast %6 : vector<16xf32> to vector<16x1xf32>
    %8 = tpu.reciprocal %7 {approx = true} : vector<16x1xf32> -> vector<16x1xf32>
    %9 = arith.mulf %7, %8 : vector<16x1xf32>
    %cst_2 = arith.constant 2.000000e+00 : f32
    %10 = vector.broadcast %cst_2 : f32 to vector<16x1xf32>
    %11 = arith.subf %10, %9 : vector<16x1xf32>
    %12 = arith.mulf %8, %11 : vector<16x1xf32>
    %13 = vector.broadcast %12 : vector<16x1xf32> to vector<16x32xf32>
    %14 = arith.mulf %5, %13 : vector<16x32xf32>
    %c0_3 = arith.constant 0 : index
    %c0_4 = arith.constant 0 : index
    %15 = vector.load %arg2[%c0_3, %c0_4] : memref<16x128xf32, #tpu.memory_space<vmem>>, vector<16x32xf32>
    tpu.vector_store %arg2[%c0_3, %c0_4], %14 {strides = array<i32>} : memref<16x128xf32, #tpu.memory_space<vmem>>, vector<16x32xf32>,
    %c0_5 = arith.constant 0 : index
    %c32 = arith.constant 32 : index
    %16 = vector.load %arg1[%c0_5, %c32] : memref<16x128xf32, #tpu.memory_space<vmem>>, vector<16x32xf32>
    %cst_6 = arith.constant dense<0xFF800000> : vector<16xf32>
    %17 = vector.multi_reduction <maximumf>, %16, %cst_6 [1] : vector<16x32xf32> to vector<16xf32>
    %18 = vector.shape_cast %17 : vector<16xf32> to vector<16x1xf32>
    %19 = vector.broadcast %18 : vector<16x1xf32> to vector<16x32xf32>
    %20 = arith.subf %16, %19 : vector<16x32xf32>
    %21 = math.exp %20 : vector<16x32xf32>
    %cst_7 = arith.constant dense<0.000000e+00> : vector<16xf32>
    %22 = vector.multi_reduction <add>, %21, %cst_7 [1] : vector<16x32xf32> to vector<16xf32>
    %23 = vector.shape_cast %22 : vector<16xf32> to vector<16x1xf32>
    %24 = tpu.reciprocal %23 {approx = true} : vector<16x1xf32> -> vector<16x1xf32>
    %25 = arith.mulf %23, %24 : vector<16x1xf32>
    %cst_8 = arith.constant 2.000000e+00 : f32
    %26 = vector.broadcast %cst_8 : f32 to vector<16x1xf32>
    %27 = arith.subf %26, %25 : vector<16x1xf32>
    %28 = arith.mulf %24, %27 : vector<16x1xf32>
    %29 = vector.broadcast %28 : vector<16x1xf32> to vector<16x32xf32>
    %30 = arith.mulf %21, %29 : vector<16x32xf32>
    %c0_9 = arith.constant 0 : index
    %c32_10 = arith.constant 32 : index
    %31 = vector.load %arg2[%c0_9, %c32_10] : memref<16x128xf32, #tpu.memory_space<vmem>>, vector<16x32xf32>
    tpu.vector_store %arg2[%c0_9, %c32_10], %30 {strides = array<i32>} : memref<16x128xf32, #tpu.memory_space<vmem>>, vector<16x32xf32>,
    %c0_11 = arith.constant 0 : index
    %c64 = arith.constant 64 : index
    %32 = vector.load %arg1[%c0_11, %c64] : memref<16x128xf32, #tpu.memory_space<vmem>>, vector<16x32xf32>
    %cst_12 = arith.constant dense<0xFF800000> : vector<16xf32>
    %33 = vector.multi_reduction <maximumf>, %32, %cst_12 [1] : vector<16x32xf32> to vector<16xf32>
    %34 = vector.shape_cast %33 : vector<16xf32> to vector<16x1xf32>
    %35 = vector.broadcast %34 : vector<16x1xf32> to vector<16x32xf32>
    %36 = arith.subf %32, %35 : vector<16x32xf32>
    %37 = math.exp %36 : vector<16x32xf32>
    %cst_13 = arith.constant dense<0.000000e+00> : vector<16xf32>
    %38 = vector.multi_reduction <add>, %37, %cst_13 [1] : vector<16x32xf32> to vector<16xf32>
    %39 = vector.shape_cast %38 : vector<16xf32> to vector<16x1xf32>
    %40 = tpu.reciprocal %39 {approx = true} : vector<16x1xf32> -> vector<16x1xf32>
    %41 = arith.mulf %39, %40 : vector<16x1xf32>
    %cst_14 = arith.constant 2.000000e+00 : f32
    %42 = vector.broadcast %cst_14 : f32 to vector<16x1xf32>
    %43 = arith.subf %42, %41 : vector<16x1xf32>
    %44 = arith.mulf %40, %43 : vector<16x1xf32>
    %45 = vector.broadcast %44 : vector<16x1xf32> to vector<16x32xf32>
    %46 = arith.mulf %37, %45 : vector<16x32xf32>
    %c0_15 = arith.constant 0 : index
    %c64_16 = arith.constant 64 : index
    %47 = vector.load %arg2[%c0_15, %c64_16] : memref<16x128xf32, #tpu.memory_space<vmem>>, vector<16x32xf32>
    tpu.vector_store %arg2[%c0_15, %c64_16], %46 {strides = array<i32>} : memref<16x128xf32, #tpu.memory_space<vmem>>, vector<16x32xf32>,
    %c0_17 = arith.constant 0 : index
    %c96 = arith.constant 96 : index
    %48 = vector.load %arg1[%c0_17, %c96] : memref<16x128xf32, #tpu.memory_space<vmem>>, vector<16x32xf32>
    %cst_18 = arith.constant dense<0xFF800000> : vector<16xf32>
    %49 = vector.multi_reduction <maximumf>, %48, %cst_18 [1] : vector<16x32xf32> to vector<16xf32>
    %50 = vector.shape_cast %49 : vector<16xf32> to vector<16x1xf32>
    %51 = vector.broadcast %50 : vector<16x1xf32> to vector<16x32xf32>
    %52 = arith.subf %48, %51 : vector<16x32xf32>
    %53 = math.exp %52 : vector<16x32xf32>
    %cst_19 = arith.constant dense<0.000000e+00> : vector<16xf32>
    %54 = vector.multi_reduction <add>, %53, %cst_19 [1] : vector<16x32xf32> to vector<16xf32>
    %55 = vector.shape_cast %54 : vector<16xf32> to vector<16x1xf32>
    %56 = tpu.reciprocal %55 {approx = true} : vector<16x1xf32> -> vector<16x1xf32>
    %57 = arith.mulf %55, %56 : vector<16x1xf32>
    %cst_20 = arith.constant 2.000000e+00 : f32
    %58 = vector.broadcast %cst_20 : f32 to vector<16x1xf32>
    %59 = arith.subf %58, %57 : vector<16x1xf32>
    %60 = arith.mulf %56, %59 : vector<16x1xf32>
    %61 = vector.broadcast %60 : vector<16x1xf32> to vector<16x32xf32>
    %62 = arith.mulf %53, %61 : vector<16x32xf32>
    %c0_21 = arith.constant 0 : index
    %c96_22 = arith.constant 96 : index
    %63 = vector.load %arg2[%c0_21, %c96_22] : memref<16x128xf32, #tpu.memory_space<vmem>>, vector<16x32xf32>
    tpu.vector_store %arg2[%c0_21, %c96_22], %62 {strides = array<i32>} : memref<16x128xf32, #tpu.memory_space<vmem>>, vector<16x32xf32>,
    return
  }
  func.func @transform_0(%arg0: i32) -> (i32, i32) {
    %c0_i32 = arith.constant 0 : i32
    %c0_i32_0 = arith.constant 0 : i32
    return %arg0, %c0_i32 : i32, i32
  }
  func.func @transform_1(%arg0: i32) -> (i32, i32) {
    %c0_i32 = arith.constant 0 : i32
    %c0_i32_0 = arith.constant 0 : i32
    return %arg0, %c0_i32 : i32, i32
  }
}

</mosaic_0001>

<bundles_post_ra>
// kernel: tpu_custom_call.1
= control target key start
LH: loop header
LB: loop body
LE: loop exit
PB: predicated region body
PF: predicated region fallthrough
CT: control target
= control target key end

     0   :  { %6 = vsyncpa [#allocation3], 0  ;;  %s388_s0 = inlined_call_operand.hbm [shape: f32[16,128], index: 0, kind: input, shape index: {}]   ;;  %s389_s1 = inlined_call_operand.hbm [shape: f32[16,128], index: 1, kind: output, shape index: {}]  }
   0x1   :  { %7 = vsyncpa [#allocation4], 0  ;;  %s283_s6 = smov [#allocation2]   ;;  %s235_s10 = scalar_lea.hbm %s388_s0, 256 }
   0x2   :  { %s13_s7 = sshll.u32 %s283_s6, 4  ;;  %p236_p0 = scmp.ne.s32.totalorder %s388_s0, %s235_s10  ;;  %s14_s7 = int_to_ptr.vmem [resolvable:$true] %s13_s7 }
   0x3   :  { %p239_p1 = scmp.lt.u32.totalorder %s235_s10, %s388_s0 }
   0x5   :  { %p241_p2 = pnand %p239_p1, %p236_p0 }
   0x7   :  { %244 = shalt.err (!%p241_p2)
}
   0x8   :  { %s245_s15 = scalar_lea.vmem %s14_s7, 256  ;;  %p250_p4 = scmp.lt.s32.totalorder %s14_s7, %s14_s7 }
   0x9   :  { %p246_p3 = scmp.ne.s32.totalorder %s14_s7, %s245_s15  ;;  %p251_p5 = scmp.lt.s32.totalorder %s245_s15, %s245_s15 }
   0xb   :  { %p252_p6 = por %p251_p5, %p250_p4 }
   0xd   :  { %p253_p7 = pnand %p252_p6, %p246_p3 }
   0xf   :  { %256 = shalt.err (!%p253_p7)
}
  0x10   :  { %s284_s16 = smov 128   ;;  %s285_s17 = smov 8  }
  0x11   :  { %19 = dma.hbm_to_vmem [thread:$0]  %s388_s0, 256, %s14_s7, [#allocation3], %s284_s16, %s284_s16, %s285_s17  }
  0x12   :  { %279 = dma.done.wait [#allocation3], 256  }
  0x13   :  { %280 = vsyncadd [#allocation3], 4294967040  ;;  %vm58_vm0 = vcmask 523520   ;;  %vm99_vm1 = vcmask 785920   ;;  %v56_v0 = vld [vmem:[#allocation2] sm:$0xff]  ;;  %v315_v1 = vld [vmem:[#allocation2 + $0x8] sm:$0xff] }
  0x14   :  { %v59_v2 = vsel %vm58_vm0, %v56_v0, -inf  ;;  %v100_v3 = vsel %vm99_vm1, %v56_v0, -inf  ;;  %v62_v4 = vsel %vm58_vm0, %v315_v1, -inf  ;;  %v103_v5 = vsel %vm99_vm1, %v315_v1, -inf  ;;  %s286_s0 = smov 96   ;;  %s287_s20 = smov 64  }
  0x15   :  { %60 = vmax.xlane.f32.xlu0 %v59_v2  ;;  %101 = vmax.xlane.f32.xlu1 %v100_v3  ;;  %vm140_vm2 = vcmask 1048320   ;;  %vm25_vm3 = vcmask 261120   ;;  %s288_s21 = smov 32   ;;  %s289_s22 = smov [#allocation5]  }
  0x16   :  { %v141_v6 = vsel %vm140_vm2, %v56_v0, -inf  ;;  %v144_v7 = vsel %vm140_vm2, %v315_v1, -inf  ;;  %v26_v8 = vsel %vm25_vm3, %v56_v0, -inf  ;;  %v29_v9 = vsel %vm25_vm3, %v315_v1, -inf  ;;  %s184_s23 = sshll.u32 %s289_s22, 4  ;;  %s185_s23 = int_to_ptr.vmem [resolvable:$true] %s184_s23 }
  0x17   :  { %s257_s24 = scalar_lea.vmem %s185_s23, 256  ;;  %p262_p9 = scmp.lt.s32.totalorder %s185_s23, %s185_s23 }
  0x18   :  { %p258_p8 = scmp.ne.s32.totalorder %s185_s23, %s257_s24  ;;  %p263_p10 = scmp.lt.s32.totalorder %s257_s24, %s257_s24 }
  0x19   :  { %63 = vmax.xlane.f32.xlu0 %v62_v4  ;;  %104 = vmax.xlane.f32.xlu1 %v103_v5 }
  0x1a   :  { %p264_p11 = por %p263_p10, %p262_p9 }
  0x1c   :  { %p265_p12 = pnand %p264_p11, %p258_p8 }
  0x1d   :  { %142 = vmax.xlane.f32.xlu0 %v141_v6  ;;  %145 = vmax.xlane.f32.xlu1 %v144_v7 }
  0x21   :  { %27 = vmax.xlane.f32.xlu0 %v26_v8  ;;  %30 = vmax.xlane.f32.xlu1 %v29_v9 }
  0xa2   :  { %v61_v10 = vpop.xlane.xlu0 %60  ;;  %v102_v11 = vpop.xlane.xlu1 %101 }
  0xa3   :  { %v65_v12 = vsub.f32 %v56_v0, %v61_v10  ;;  %v106_v14 = vsub.f32 %v56_v0, %v102_v11 }
  0xa5   :  { %v67_v13 = vmul.f32 1.442695, %v65_v12  ;;  %v108_v19 = vmul.f32 1.442695, %v106_v14 }
  0xa6   :  { %v64_v15 = vpop.xlane.xlu0 %63  ;;  %v105_v16 = vpop.xlane.xlu1 %104 }
  0xa7   :  { %203 = vpow2.f32 %v67_v13  ;;  %v66_v17 = vsub.f32 %v315_v1, %v64_v15  ;;  %v107_v20 = vsub.f32 %v315_v1, %v105_v16 }
  0xa9   :  { %v69_v18 = vmul.f32 1.442695, %v66_v17  ;;  %v110_v25 = vmul.f32 1.442695, %v107_v20 }
  0xaa   :  { %v143_v21 = vpop.xlane.xlu0 %142  ;;  %v146_v22 = vpop.xlane.xlu1 %145 }
  0xab   :  { %205 = vpow2.f32 %v69_v18  ;;  %v147_v23 = vsub.f32 %v56_v0, %v143_v21  ;;  %v148_v26 = vsub.f32 %v315_v1, %v146_v22 }
  0xac   :  { %207 = vpow2.f32 %v108_v19 }
  0xad   :  { %v149_v24 = vmul.f32 1.442695, %v147_v23  ;;  %v151_v28 = vmul.f32 1.442695, %v148_v26 }
  0xae   :  { %v28_v33 = vpop.xlane.xlu0 %27  ;;  %v31_v37 = vpop.xlane.xlu1 %30 }
  0xaf   :  { %209 = vpow2.f32 %v149_v24  ;;  %v32_v35 = vsub.f32 %v56_v0, %v28_v33  ;;  %v33_v38 = vsub.f32 %v315_v1, %v31_v37 }
  0xb0   :  { %211 = vpow2.f32 %v110_v25 }
  0xb1   :  { %v332_v27 = vpop.eup %203  ;;  %213 = vpow2.f32 %v151_v28  ;;  %v34_v36 = vmul.f32 1.442695, %v32_v35  ;;  %v36_v39 = vmul.f32 1.442695, %v33_v38 }
  0xb2   :  { %73 = vrot.lane.b32.xlu0 %v332_v27, %s286_s0 }
  0xb3   :  { %215 = vpow2.f32 %v34_v36 }
  0xb4   :  { %217 = vpow2.f32 %v36_v39 }
  0xb5   :  { %v335_v29 = vpop.eup %205 }
  0xb6   :  { %75 = vrot.lane.b32.xlu1 %v335_v29, %s286_s0  ;;  %v338_v30 = vpop.eup %207 }
  0xb9   :  { %v340_v31 = vpop.eup %209 }
  0xba   :  { %114 = vrot.lane.b32.xlu1 %v338_v30, %s287_s20  ;;  %155 = vrot.lane.b32.xlu0 %v340_v31, %s288_s21  ;;  %v344_v32 = vpop.eup %211 }
  0xbb   :  { %v347_v34 = vpop.eup %213 }
  0xbd   :  { %v216_v40 = vpop.eup %215 }
  0xbe   :  { %116 = vrot.lane.b32.xlu1 %v344_v32, %s287_s20  ;;  %v38_v41 = vsel %vm25_vm3, %v216_v40, 0.0  ;;  %v218_v42 = vpop.eup %217 }
  0xbf   :  { %v41_v43 = vsel %vm25_vm3, %v218_v42, 0.0 }
  0xc2   :  { %157 = vrot.lane.b32.xlu1 %v347_v34, %s288_s21 }
  0xd9   :  { %39 = vadd.xlane.f32.xlu0 %v38_v41 }
  0xe6   :  { %42 = vadd.xlane.f32.xlu1 %v41_v43 }
 0x124   :  { %v74_v44 = vpop.permute.xlu0 %73 }
 0x125   :  { %v79_v45 = vsel %vm25_vm3, %v74_v44, 0.0 }
 0x126   :  { %80 = vadd.xlane.f32.xlu0 %v79_v45 }
 0x128   :  { %v76_v46 = vpop.permute.xlu1 %75 }
 0x129   :  { %v82_v47 = vsel %vm25_vm3, %v76_v46, 0.0 }
 0x12a   :  { %83 = vadd.xlane.f32.xlu0 %v82_v47 }
 0x12c   :  { %v115_v48 = vpop.permute.xlu1 %114  ;;  %v156_v49 = vpop.permute.xlu0 %155 }
 0x12d   :  { %v120_v50 = vsel %vm25_vm3, %v115_v48, 0.0  ;;  %v161_v51 = vsel %vm25_vm3, %v156_v49, 0.0 }
 0x12e   :  { %121 = vadd.xlane.f32.xlu0 %v120_v50 }
 0x130   :  { %v117_v52 = vpop.permute.xlu1 %116 }
 0x131   :  { %v123_v53 = vsel %vm25_vm3, %v117_v52, 0.0 }
 0x132   :  { %124 = vadd.xlane.f32.xlu1 %v123_v53  ;;  %162 = vadd.xlane.f32.xlu0 %v161_v51 }
 0x134   :  { %v158_v54 = vpop.permute.xlu1 %157 }
 0x135   :  { %v164_v55 = vsel %vm25_vm3, %v158_v54, 0.0 }
 0x136   :  { %165 = vadd.xlane.f32.xlu1 %v164_v55 }
 0x166   :  { %v40_v56 = vpop.xlane.xlu0 %39 }
 0x167   :  { %219 = vrcp.f32 %v40_v56 }
 0x171   :  { %v220_v57 = vpop.eup %219 }
 0x172   :  { %v46_v58 = vmul.f32 %v220_v57, %v40_v56 }
 0x173   :  { %v43_v59 = vpop.xlane.xlu1 %42 }
 0x174   :  { %v48_v60 = vsub.f32 2.0, %v46_v58  ;;  %221 = vrcp.f32 %v43_v59 }
 0x176   :  { %v50_v61 = vmul.f32 %v220_v57, %v48_v60 }
 0x178   :  { %v52_v62 = vmul.f32 %v216_v40, %v50_v61 }
 0x17a   :  { %54 = vst.msk [vmem:[#allocation5] sm:$0xff] %vm25_vm3, %v52_v62 }
 0x17e   :  { %v222_v63 = vpop.eup %221 }
 0x17f   :  { %v47_v0 = vmul.f32 %v222_v63, %v43_v59 }
 0x181   :  { %v49_v1 = vsub.f32 2.0, %v47_v0 }
 0x183   :  { %v51_v2 = vmul.f32 %v222_v63, %v49_v1 }
 0x185   :  { %v53_v3 = vmul.f32 %v218_v42, %v51_v2 }
 0x187   :  { %55 = vst.msk [vmem:[#allocation5 + $0x8] sm:$0xff] %vm25_vm3, %v53_v3 }
 0x1b3   :  { %v81_v4 = vpop.xlane.xlu0 %80 }
 0x1b4   :  { %223 = vrcp.f32 %v81_v4 }
 0x1b7   :  { %v84_v5 = vpop.xlane.xlu0 %83 }
 0x1b8   :  { %225 = vrcp.f32 %v84_v5 }
 0x1bb   :  { %v122_v6 = vpop.xlane.xlu0 %121 }
 0x1bc   :  { %227 = vrcp.f32 %v122_v6 }
 0x1be   :  { %v224_v7 = vpop.eup %223 }
 0x1bf   :  { %v87_v8 = vmul.f32 %v224_v7, %v81_v4  ;;  %v125_v9 = vpop.xlane.xlu1 %124  ;;  %v163_v10 = vpop.xlane.xlu0 %162 }
 0x1c0   :  { %229 = vrcp.f32 %v125_v9 }
 0x1c1   :  { %v89_v11 = vsub.f32 2.0, %v87_v8  ;;  %231 = vrcp.f32 %v163_v10 }
 0x1c2   :  { %v226_v12 = vpop.eup %225 }
 0x1c3   :  { %v91_v13 = vmul.f32 %v224_v7, %v89_v11  ;;  %v88_v14 = vmul.f32 %v226_v12, %v84_v5  ;;  %v166_v15 = vpop.xlane.xlu1 %165 }
 0x1c4   :  { %233 = vrcp.f32 %v166_v15 }
 0x1c5   :  { %v93_v16 = vmul.f32 %v332_v27, %v91_v13  ;;  %v90_v17 = vsub.f32 2.0, %v88_v14 }
 0x1c6   :  { %v228_v18 = vpop.eup %227 }
 0x1c7   :  { %95 = vst.msk [vmem:[#allocation5] sm:$0xff] %vm58_vm0, %v93_v16  ;;  %v92_v19 = vmul.f32 %v226_v12, %v90_v17  ;;  %v128_v20 = vmul.f32 %v228_v18, %v122_v6 }
 0x1c9   :  { %v94_v21 = vmul.f32 %v335_v29, %v92_v19  ;;  %v130_v22 = vsub.f32 2.0, %v128_v20 }
 0x1ca   :  { %v230_v23 = vpop.eup %229 }
 0x1cb   :  { %v232_v24 = vpop.eup %231  ;;  %96 = vst.msk [vmem:[#allocation5 + $0x8] sm:$0xff] %vm58_vm0, %v94_v21  ;;  %v132_v25 = vmul.f32 %v228_v18, %v130_v22  ;;  %v129_v26 = vmul.f32 %v230_v23, %v125_v9 }
 0x1cc   :  { %v169_v28 = vmul.f32 %v232_v24, %v163_v10 }
 0x1cd   :  { %v134_v33 = vmul.f32 %v338_v30, %v132_v25  ;;  %v131_v35 = vsub.f32 2.0, %v129_v26 }
 0x1ce   :  { %v234_v27 = vpop.eup %233  ;;  %v171_v36 = vsub.f32 2.0, %v169_v28 }
 0x1cf   :  { %136 = vst.msk [vmem:[#allocation5] sm:$0xff] %vm99_vm1, %v134_v33  ;;  %v133_v37 = vmul.f32 %v230_v23, %v131_v35  ;;  %v170_v38 = vmul.f32 %v234_v27, %v166_v15 }
 0x1d0   :  { %v173_v39 = vmul.f32 %v232_v24, %v171_v36 }
 0x1d1   :  { %v135_v29 = vmul.f32 %v344_v32, %v133_v37  ;;  %v172_v40 = vsub.f32 2.0, %v170_v38 }
 0x1d2   :  { %v175_v41 = vmul.f32 %v340_v31, %v173_v39 }
 0x1d3   :  { %137 = vst.msk [vmem:[#allocation5 + $0x8] sm:$0xff] %vm99_vm1, %v135_v29  ;;  %v174_v42 = vmul.f32 %v234_v27, %v172_v40 }
 0x1d4   :  { %177 = vst.msk [vmem:[#allocation5] sm:$0xff] %vm140_vm2, %v175_v41 }
 0x1d5   :  { %v176_v30 = vmul.f32 %v347_v34, %v174_v42 }
 0x1d7   :  { %178 = vst.msk [vmem:[#allocation5 + $0x8] sm:$0xff] %vm140_vm2, %v176_v30 }
 0x1d8   :  { %268 = shalt.err (!%p265_p12)
}
 0x1d9   :  { %s269_s27 = scalar_lea.hbm %s389_s1, 256 }
 0x1da   :  { %p270_p13 = scmp.ne.s32.totalorder %s389_s1, %s269_s27  ;;  %p273_p0 = scmp.lt.u32.totalorder %s269_s27, %s389_s1 }
 0x1dc   :  { %p275_p1 = pnand %p273_p0, %p270_p13 }
 0x1de   :  { %278 = shalt.err (!%p275_p1)
}
 0x1df   :  { %190 = dma.vmem_to_hbm [thread:$0]  %s185_s23, 256, %s389_s1, [#allocation4], %s284_s16, %s284_s16, %s285_s17  }
 0x1e0   :  { %281 = dma.done.wait [#allocation4], 256  }
 0x1e1   :  { %282 = vsyncadd [#allocation4], 4294967040 }
 0x1e2   :  { %194 = vsyncpa [#allocation3], 1 }
 0x1e3   :  { %195 = vsyncpa [#allocation4], 1 }

</bundles_post_ra>
